<compile_context>
chip_gen: v7x
topology: tpu7x:2x2x1
jax: 0.10.0
libtpu: 0.0.40
codegen_flags: <defaults>
</compile_context>

<pallas_src>
import jax
import jax.numpy as jnp
from jax.experimental import pallas as pl
from jax.experimental.pallas import tpu as pltpu


LANE = 128
SUBLANE = 16  # bf16 packs 2 rows per sublane -> batch tiles are multiples of 16


def _round_up(n, m):
    return ((n + m - 1) // m) * m


def actor_kernel(x_ref, w1_ref, b1_ref, w2_ref, b2_ref, w3_ref, b3_ref,
                 out_ref):
    # First layer: x arrives as bf16; the 1/n_actions scale is folded into w1.
    x = x_ref[...]
    h1 = jnp.dot(x, w1_ref[...], preferred_element_type=jnp.float32)
    h1 = jnp.maximum(h1 + b1_ref[...], 0.0).astype(jnp.bfloat16)

    # Second layer (padded hidden columns stay exactly zero through ReLU).
    h2 = jnp.dot(h1, w2_ref[...], preferred_element_type=jnp.float32)
    h2 = jnp.maximum(h2 + b2_ref[...], 0.0).astype(jnp.bfloat16)

    # Output layer: padded columns get bias -1e30 -> softmax prob ~ 0.
    # Logit accumulation stays f32, so -1e30 is representable.
    logits = jnp.dot(h2, w3_ref[...], preferred_element_type=jnp.float32)
    logits = logits + b3_ref[...]

    # Numerically stable softmax over the full 128-lane block; bf16 store
    # halves the dominant (output) HBM stream.
    m = jnp.max(logits, axis=-1, keepdims=True)
    e = jnp.exp(logits - m)
    s = jnp.sum(e, axis=-1, keepdims=True)
    out_ref[...] = (e * pl.reciprocal(s, approx=True)).astype(out_ref.dtype)


def prepare_params(params, n_actions):
    """One-time parameter prep: fold the 1/n_actions input scale into w1,
    zero-pad all lane dims to 128, mask padded output columns via bias=-1e30,
    and store weights as bf16 (biases stay f32)."""
    w1, b1, w2, b2, w3, b3 = params
    d_in, h1 = w1.shape
    h2 = w2.shape[1]
    n_out = w3.shape[1]
    h1p = _round_up(h1, LANE)
    h2p = _round_up(h2, LANE)
    n_outp = _round_up(n_out, LANE)

    w1 = w1 / float(n_actions)  # permanent constant fold of x / n_actions

    w1p = jnp.zeros((d_in, h1p), jnp.float32).at[:, :h1].set(w1)
    b1p = jnp.zeros((1, h1p), jnp.float32).at[:, :h1].set(b1.reshape(1, h1))
    w2p = jnp.zeros((h1p, h2p), jnp.float32).at[:h1, :h2].set(w2)
    b2p = jnp.zeros((1, h2p), jnp.float32).at[:, :h2].set(b2.reshape(1, h2))
    w3p = jnp.zeros((h2p, n_outp), jnp.float32).at[:h2, :n_out].set(w3)
    b3p = jnp.full((1, n_outp), -1e30, jnp.float32).at[:, :n_out].set(
        b3.reshape(1, n_out))

    return (w1p.astype(jnp.bfloat16), b1p,
            w2p.astype(jnp.bfloat16), b2p,
            w3p.astype(jnp.bfloat16), b3p)


def _pick_batch_tile(B, block_b):
    """Batch tile: multiple of 16 (bf16 sublane packing), capped by block_b.
    Shrink (rather than serialize) so the grid has >= 2 steps when B allows:
    that lets dimension_semantics=("parallel",) shard across v7x's two TCs."""
    tb = max(SUBLANE, min(block_b, _round_up(B, SUBLANE)))
    tb = (tb // SUBLANE) * SUBLANE
    while tb > SUBLANE and _round_up(B, tb) // tb < 2:
        tb = max(SUBLANE, ((tb // 2) // SUBLANE) * SUBLANE)
    return tb


def actor_forward(x, padded_params, n_actions, block_b=512):
    """x: (B, input_dims) float -> (B, n_actions) float32 softmax probs."""
    w1, b1, w2, b2, w3, b3 = padded_params
    B, D = x.shape
    n_outp = w3.shape[1]

    tb = _pick_batch_tile(B, block_b)
    B_pad = _round_up(B, tb)
    if B_pad // tb < 2:
        # Never run a single-step grid: pad to 2 tiles so both v7x TensorCores
        # get work and the in/out pipeline overlaps (harmless on v5e/v6e).
        B_pad = 2 * tb
    grid = (B_pad // tb,)

    # Halve the input HBM stream: layer 1 runs in bf16 anyway.
    xb = x.astype(jnp.bfloat16)
    if B_pad != B:
        xb = jnp.pad(xb, ((0, B_pad - B), (0, 0)))

    def resident(shape):
        # Weights/biases: one full block, constant index map -> stays in VMEM.
        return pl.BlockSpec(shape, lambda i: tuple(0 for _ in shape))

    weight_bytes = sum(int(a.size) * a.dtype.itemsize
                       for a in (w1, b1, w2, b2, w3, b3))
    cost = pl.CostEstimate(
        flops=2 * B_pad * (D * w1.shape[1] + w1.shape[1] * w2.shape[1]
                           + w2.shape[1] * n_outp),
        transcendentals=B_pad * n_outp,
        bytes_accessed=B_pad * D * 2 + B_pad * n_outp * 2 + weight_bytes,
    )

    out = pl.pallas_call(
        actor_kernel,
        out_shape=jax.ShapeDtypeStruct((B_pad, n_outp), jnp.bfloat16),
        grid_spec=pl.GridSpec(
            grid=grid,
            in_specs=[
                pl.BlockSpec((tb, D), lambda i: (i, 0)),
                resident(w1.shape), resident(b1.shape),
                resident(w2.shape), resident(b2.shape),
                resident(w3.shape), resident(b3.shape),
            ],
            out_specs=pl.BlockSpec((tb, n_outp), lambda i: (i, 0)),
        ),
        compiler_params=pltpu.CompilerParams(
            dimension_semantics=("parallel",),
            vmem_limit_bytes=32 * 1024 * 1024,  # headroom on v5e's 16 MiB default
        ),
        cost_estimate=cost,
    )(xb, w1, b1, w2, b2, w3, b3)

    # One fused slice+cast: drop padded batch rows / action columns, back to f32.
    return out[:B, :n_actions].astype(jnp.float32)


def init_linear(key, fan_in, fan_out):
    """Deterministic init mimicking torch.nn.Linear default (uniform +/- 1/sqrt(fan_in)).
    Weight is stored as (fan_in, fan_out) so the kernel computes x @ W."""
    kw, kb = jax.random.split(key)
    bound = 1.0 / jnp.sqrt(jnp.float32(fan_in))
    w = jax.random.uniform(kw, (fan_in, fan_out), jnp.float32, -bound, bound)
    b = jax.random.uniform(kb, (1, fan_out), jnp.float32, -bound, bound)
    return w, b


if __name__ == "__main__":
    # Small shapes consistent with the module: batch=16, input_dims=32, 4 actions.
    batch = 16
    input_dims = 32
    n_actions = 4

    key = jax.random.PRNGKey(0)
    kx, k1, k2, k3 = jax.random.split(key, 4)

    x = jax.random.normal(kx, (batch, input_dims), jnp.float32)

    w1, b1 = init_linear(k1, input_dims, 64)
    w2, b2 = init_linear(k2, 64, 32)
    w3, b3 = init_linear(k3, 32, n_actions)
    raw_params = (w1, b1, w2, b2, w3, b3)

    # One-time prep: fold input scale, pad lanes to 128, cast weights to bf16.
    params = prepare_params(raw_params, n_actions)

    # Default block_b=512 -> tb=16, batch padded to 32, grid of 2 steps
    # (exercises the pipelined, batch-parallel grid even at this tiny batch).
    probs = actor_forward(x, params, n_actions)
    probs = jax.block_until_ready(probs)

    # Reference in plain f32 JAX (original module math, no padding/bf16).
    xs = x / n_actions
    h1 = jnp.maximum(xs @ w1 + b1, 0.0)
    h2 = jnp.maximum(h1 @ w2 + b2, 0.0)
    logits = h2 @ w3 + b3
    ref = jax.nn.softmax(logits, axis=-1)

    assert probs.shape == (batch, n_actions)
    # bf16 output quantization + approx reciprocal: rows sum to 1 within ~1e-2.
    assert jnp.allclose(jnp.sum(probs, axis=-1), 1.0, atol=1e-2)
    assert jnp.allclose(probs, ref, atol=2e-2, rtol=2e-2)

    print("KERNEL_OK")
</pallas_src>

<mosaic_0001>
module attributes {stable_mosaic.version = 11 : i64} {
  func.func @actor_kernel(%arg0: i32, %arg1: memref<16x32xbf16, #tpu.memory_space<vmem>>, %arg2: memref<32x128xbf16, #tpu.memory_space<vmem>>, %arg3: memref<1x128xf32, #tpu.memory_space<vmem>>, %arg4: memref<128x128xbf16, #tpu.memory_space<vmem>>, %arg5: memref<1x128xf32, #tpu.memory_space<vmem>>, %arg6: memref<128x128xbf16, #tpu.memory_space<vmem>>, %arg7: memref<1x128xf32, #tpu.memory_space<vmem>>, %arg8: memref<16x128xbf16, #tpu.memory_space<vmem>>) attributes {dimension_semantics = [#tpu.dimension_semantics<parallel>], iteration_bounds = array<i64: 2>, scalar_prefetch = 0 : i64, scratch_operands = 0 : i64, tpu.core_type = #tpu.core_type<tc>, window_params = [{transform_indices = @transform_0, window_bounds = array<i64: 16, 32>}, {pipeline_mode = #tpu.pipeline_mode<synchronous>, transform_indices = @transform_1, window_bounds = array<i64: 32, 128>}, {pipeline_mode = #tpu.pipeline_mode<synchronous>, transform_indices = @transform_2, window_bounds = array<i64: 1, 128>}, {pipeline_mode = #tpu.pipeline_mode<synchronous>, transform_indices = @transform_3, window_bounds = array<i64: 128, 128>}, {pipeline_mode = #tpu.pipeline_mode<synchronous>, transform_indices = @transform_4, window_bounds = array<i64: 1, 128>}, {pipeline_mode = #tpu.pipeline_mode<synchronous>, transform_indices = @transform_5, window_bounds = array<i64: 128, 128>}, {pipeline_mode = #tpu.pipeline_mode<synchronous>, transform_indices = @transform_6, window_bounds = array<i64: 1, 128>}, {transform_indices = @transform_7, window_bounds = array<i64: 16, 128>}]} {
    %c0 = arith.constant 0 : index
    %c0_0 = arith.constant 0 : index
    %0 = vector.load %arg1[%c0, %c0_0] : memref<16x32xbf16, #tpu.memory_space<vmem>>, vector<16x32xbf16>
    %c0_1 = arith.constant 0 : index
    %c0_2 = arith.constant 0 : index
    %1 = vector.load %arg2[%c0_1, %c0_2] : memref<32x128xbf16, #tpu.memory_space<vmem>>, vector<32x128xbf16>
    %cst = arith.constant dense<0.000000e+00> : vector<16x128xf32>
    %2 = tpu.matmul %0, %1, %cst {dimension_numbers = #tpu.dot_dimension_numbers<[1], [0], [0], [1], [0, 0, 1, 1], [], []>} : vector<16x32xbf16>, vector<32x128xbf16>, vector<16x128xf32> -> vector<16x128xf32>
    %c0_3 = arith.constant 0 : index
    %c0_4 = arith.constant 0 : index
    %3 = vector.load %arg3[%c0_3, %c0_4] : memref<1x128xf32, #tpu.memory_space<vmem>>, vector<1x128xf32>
    %4 = vector.broadcast %3 : vector<1x128xf32> to vector<16x128xf32>
    %5 = arith.addf %2, %4 : vector<16x128xf32>
    %cst_5 = arith.constant 0.000000e+00 : f32
    %6 = vector.broadcast %cst_5 : f32 to vector<16x128xf32>
    %7 = arith.maximumf %5, %6 : vector<16x128xf32>
    %8 = arith.truncf %7 : vector<16x128xf32> to vector<16x128xbf16>
    %c0_6 = arith.constant 0 : index
    %c0_7 = arith.constant 0 : index
    %9 = vector.load %arg4[%c0_6, %c0_7] : memref<128x128xbf16, #tpu.memory_space<vmem>>, vector<128x128xbf16>
    %cst_8 = arith.constant dense<0.000000e+00> : vector<16x128xf32>
    %10 = tpu.matmul %8, %9, %cst_8 {dimension_numbers = #tpu.dot_dimension_numbers<[1], [0], [0], [1], [0, 0, 1, 1], [], []>} : vector<16x128xbf16>, vector<128x128xbf16>, vector<16x128xf32> -> vector<16x128xf32>
    %c0_9 = arith.constant 0 : index
    %c0_10 = arith.constant 0 : index
    %11 = vector.load %arg5[%c0_9, %c0_10] : memref<1x128xf32, #tpu.memory_space<vmem>>, vector<1x128xf32>
    %12 = vector.broadcast %11 : vector<1x128xf32> to vector<16x128xf32>
    %13 = arith.addf %10, %12 : vector<16x128xf32>
    %cst_11 = arith.constant 0.000000e+00 : f32
    %14 = vector.broadcast %cst_11 : f32 to vector<16x128xf32>
    %15 = arith.maximumf %13, %14 : vector<16x128xf32>
    %16 = arith.truncf %15 : vector<16x128xf32> to vector<16x128xbf16>
    %c0_12 = arith.constant 0 : index
    %c0_13 = arith.constant 0 : index
    %17 = vector.load %arg6[%c0_12, %c0_13] : memref<128x128xbf16, #tpu.memory_space<vmem>>, vector<128x128xbf16>
    %cst_14 = arith.constant dense<0.000000e+00> : vector<16x128xf32>
    %18 = tpu.matmul %16, %17, %cst_14 {dimension_numbers = #tpu.dot_dimension_numbers<[1], [0], [0], [1], [0, 0, 1, 1], [], []>} : vector<16x128xbf16>, vector<128x128xbf16>, vector<16x128xf32> -> vector<16x128xf32>
    %c0_15 = arith.constant 0 : index
    %c0_16 = arith.constant 0 : index
    %19 = vector.load %arg7[%c0_15, %c0_16] : memref<1x128xf32, #tpu.memory_space<vmem>>, vector<1x128xf32>
    %20 = vector.broadcast %19 : vector<1x128xf32> to vector<16x128xf32>
    %21 = arith.addf %18, %20 : vector<16x128xf32>
    %cst_17 = arith.constant dense<0xFF800000> : vector<16xf32>
    %22 = vector.multi_reduction <maximumf>, %21, %cst_17 [1] : vector<16x128xf32> to vector<16xf32>
    %23 = vector.shape_cast %22 : vector<16xf32> to vector<16x1xf32>
    %24 = vector.broadcast %23 : vector<16x1xf32> to vector<16x128xf32>
    %25 = arith.subf %21, %24 : vector<16x128xf32>
    %26 = math.exp %25 : vector<16x128xf32>
    %cst_18 = arith.constant dense<0.000000e+00> : vector<16xf32>
    %27 = vector.multi_reduction <add>, %26, %cst_18 [1] : vector<16x128xf32> to vector<16xf32>
    %28 = vector.shape_cast %27 : vector<16xf32> to vector<16x1xf32>
    %29 = tpu.reciprocal %28 {approx = true} : vector<16x1xf32> -> vector<16x1xf32>
    %30 = vector.broadcast %29 : vector<16x1xf32> to vector<16x128xf32>
    %31 = arith.mulf %26, %30 : vector<16x128xf32>
    %32 = arith.truncf %31 : vector<16x128xf32> to vector<16x128xbf16>
    %c0_19 = arith.constant 0 : index
    %c0_20 = arith.constant 0 : index
    %33 = vector.load %arg8[%c0_19, %c0_20] : memref<16x128xbf16, #tpu.memory_space<vmem>>, vector<16x128xbf16>
    tpu.vector_store %arg8[%c0_19, %c0_20], %32 {strides = array<i32>} : memref<16x128xbf16, #tpu.memory_space<vmem>>, vector<16x128xbf16>,
    return
  }
  func.func @transform_0(%arg0: i32) -> (i32, i32) {
    %c0_i32 = arith.constant 0 : i32
    %c0_i32_0 = arith.constant 0 : i32
    return %arg0, %c0_i32 : i32, i32
  }
  func.func @transform_1(%arg0: i32) -> (i32, i32) {
    %c0_i32 = arith.constant 0 : i32
    %c0_i32_0 = arith.constant 0 : i32
    %c0_i32_1 = arith.constant 0 : i32
    return %c0_i32, %c0_i32_0 : i32, i32
  }
  func.func @transform_2(%arg0: i32) -> (i32, i32) {
    %c0_i32 = arith.constant 0 : i32
    %c0_i32_0 = arith.constant 0 : i32
    %c0_i32_1 = arith.constant 0 : i32
    return %c0_i32, %c0_i32_0 : i32, i32
  }
  func.func @transform_3(%arg0: i32) -> (i32, i32) {
    %c0_i32 = arith.constant 0 : i32
    %c0_i32_0 = arith.constant 0 : i32
    %c0_i32_1 = arith.constant 0 : i32
    return %c0_i32, %c0_i32_0 : i32, i32
  }
  func.func @transform_4(%arg0: i32) -> (i32, i32) {
    %c0_i32 = arith.constant 0 : i32
    %c0_i32_0 = arith.constant 0 : i32
    %c0_i32_1 = arith.constant 0 : i32
    return %c0_i32, %c0_i32_0 : i32, i32
  }
  func.func @transform_5(%arg0: i32) -> (i32, i32) {
    %c0_i32 = arith.constant 0 : i32
    %c0_i32_0 = arith.constant 0 : i32
    %c0_i32_1 = arith.constant 0 : i32
    return %c0_i32, %c0_i32_0 : i32, i32
  }
  func.func @transform_6(%arg0: i32) -> (i32, i32) {
    %c0_i32 = arith.constant 0 : i32
    %c0_i32_0 = arith.constant 0 : i32
    %c0_i32_1 = arith.constant 0 : i32
    return %c0_i32, %c0_i32_0 : i32, i32
  }
  func.func @transform_7(%arg0: i32) -> (i32, i32) {
    %c0_i32 = arith.constant 0 : i32
    %c0_i32_0 = arith.constant 0 : i32
    return %arg0, %c0_i32 : i32, i32
  }
}

</mosaic_0001>

<bundles_post_ra>
// kernel: tpu_custom_call.1
= control target key start
LH: loop header
LB: loop body
LE: loop exit
PB: predicated region body
PF: predicated region fallthrough
CT: control target
= control target key end

     0   :  { %12 = vsyncpa [#allocation3], 0  ;;  %s1575_s0 = inlined_call_operand.hbm [shape: bf16[32,32], index: 0, kind: input, shape index: {}]   ;;  %s1576_s1 = inlined_call_operand.hbm [shape: bf16[32,128], index: 1, kind: input, shape index: {}]   ;;  %s1577_s2 = inlined_call_operand.vmem [shape: f32[1,128], index: 2, kind: input, shape index: {}]   ;;  %s1578_s3 = inlined_call_operand.hbm [shape: bf16[128,128], index: 3, kind: input, shape index: {}]   ;;  %s1579_s4 = inlined_call_operand.vmem [shape: f32[1,128], index: 4, kind: input, shape index: {}]   ;;  %s1580_s5 = inlined_call_operand.hbm [shape: bf16[128,128], index: 5, kind: input, shape index: {}]   ;;  %s1581_s6 = inlined_call_operand.vmem [shape: f32[1,128], index: 6, kind: input, shape index: {}]   ;;  %s1582_s7 = inlined_call_operand.hbm [shape: bf16[32,128], index: 7, kind: output, shape index: {}]  }
   0x1   :  { %14 = vsyncpa [#allocation3 + $0x1], 0 }
   0x2   :  { %15 = vsyncpa [#allocation6], 0 }
   0x3   :  { %16 = vsyncpa [#allocation9], 0 }
   0x4   :  { %17 = vsyncpa [#allocation4], 0 }
   0x5   :  { %19 = vsyncpa [#allocation4 + $0x1], 0  ;;  %s1267_s24 = smov 0   ;;  %s1269_s25 = smov 0  }
   0x6   :  { %s1271_s26 = smov 0   ;;  %s1273_s27 = smov 0  }
   0x7 LB: > { %s1288_s28 = sadd.s32 4294967295, %s1214_s27   ;;  %s793_s29 = sadd.s32 4294967294, %s1214_s27   ;;  %s1214_s27 = sphi %s1273_s27, %s1608_s27   ;;  %s1210_s26 = sphi %s1271_s26, %s1607_s26   ;;  %s1206_s25 = sphi %s1269_s25, %s1606_s25   ;;  %s1202_s24 = sphi %s1267_s24, %s1605_s24  }
   0x8   : > { %p45_p0 = scmp.ne.s32.totalorder %s1206_s25, %s1202_s24  ;;  %p1583_p1 = scmp.eq.s32.totalorder %s1288_s28, 0 }
   0x9   : > { %p201_p3 = scmp.eq.s32.totalorder %s793_s29, 1  ;;  %p794_p5 = scmp.ge.s32.totalorder %s1214_s27, 1 }
   0xa   : > { %p1297_p4 = por %p1583_p1, %p45_p0  ;;  %p208_p7 = scmp.lt.s32.totalorder %s1214_s27, 3 }
   0xb   : > { %p1302_p6 = por %p201_p3, %p45_p0  ;;  %s1216_s10 = smov [#allocation5]  }
   0xc   : > { %s1587_s30 = scalar_select %p1297_p4, 1, 0 }
   0xd   : > { %s1588_s8 = scalar_select %p1302_p6, 1, 0 }
   0xe   : > { %p1307_p8 = pnand %p794_p5, %p208_p7  ;;  %s220_s11 = sshll.u32 %s1216_s10, 4  ;;  %s1311_s11 = int_to_ptr.vmem [resolvable:$true] %s220_s11 }
   0xf   : > { %1589 = sst [smem:[#allocation15_spill]] %s1588_s8  ;;  %s1217_s13 = smov [#allocation7]  }
  0x10   : > { %s1590_s9 = scalar_select %p1307_p8, 1, 0 }
  0x11   : > { %p932_p9 = pneg %p1307_p8  ;;  %s236_s14 = sshll.u32 %s1217_s13, 4  ;;  %s1322_s14 = int_to_ptr.vmem [resolvable:$true] %s236_s14 }
  0x12   : > { %s1218_s15 = smov [#allocation8]   ;;  %s1026_s19 = scalar_lea.hbm %s1576_s1, 256 }
  0x13   : > { %p1318_p11 = pnand %p932_p9, %p1583_p1  ;;  %s1324_s16 = sshll.u32 %s1218_s15, 4  ;;  %s253_s16 = int_to_ptr.vmem [resolvable:$true] %s1324_s16 }
  0x14   : > { %p1027_p12 = scmp.ne.s32.totalorder %s1576_s1, %s1026_s19  ;;  %p1033_p5 = scmp.lt.u32.totalorder %s1026_s19, %s1576_s1 }
  0x15   : > { %p1334_p13 = pneg %p1318_p11 }
  0x17   : > { %p1029_p0 = pnand %p1334_p13, %p1027_p12 }
  0x19   : > { %p1030_p3 = pneg %p1029_p0 }
  0x1b   : > { %p1035_p7 = pnand %p1033_p5, %p1030_p3 }
  0x1d   : > { %1038 = shalt.err (!%p1035_p7)
}
  0x1e   : > { %s1039_s10 = scalar_lea.vmem %s1311_s11, 256  ;;  %p1047_p2 = scmp.lt.s32.totalorder %s1311_s11, %s1311_s11 }
  0x1f   : > { %p1040_p9 = scmp.ne.s32.totalorder %s1311_s11, %s1039_s10  ;;  %p1048_p6 = scmp.lt.s32.totalorder %s1039_s10, %s1039_s10 }
  0x21   : > { %p1042_p10 = pnand %p1040_p9, %p1334_p13  ;;  %p1049_p12 = por %p1048_p6, %p1047_p2 }
  0x23   : > { %p1043_p1 = pneg %p1042_p10 }
  0x25   : > { %p1050_p0 = pnand %p1049_p12, %p1043_p1 }
  0x27   : > { %1053 = shalt.err (!%p1050_p0)
}
  0x28   : > { %s1219_s13 = smov 64   ;;  %s1220_s15 = smov 4  }
  0x29   : > { %935 = dma.hbm_to_vmem [thread:$0]  (!%p1318_p11), %s1576_s1, 256, %s1311_s11, [#allocation6], %s1219_s13, %s1219_s13, %s1220_s15  }
  0x2a   : > { %s1054_s21 = scalar_lea.hbm %s1578_s3, 1024 }
  0x2b   : > { %p1055_p1 = scmp.ne.s32.totalorder %s1578_s3, %s1054_s21  ;;  %p1061_p10 = scmp.lt.u32.totalorder %s1054_s21, %s1578_s3 }
  0x2d   : > { %p1057_p2 = pnand %p1055_p1, %p1334_p13 }
  0x2f   : > { %p1058_p6 = pneg %p1057_p2 }
  0x31   : > { %p1063_p3 = pnand %p1061_p10, %p1058_p6 }
  0x33   : > { %1066 = shalt.err (!%p1063_p3)
}
  0x34   : > { %s1067_s11 = scalar_lea.vmem %s1322_s14, 1024  ;;  %p1075_p12 = scmp.lt.s32.totalorder %s1322_s14, %s1322_s14 }
  0x35   : > { %p1068_p5 = scmp.ne.s32.totalorder %s1322_s14, %s1067_s11  ;;  %p1076_p0 = scmp.lt.s32.totalorder %s1067_s11, %s1067_s11 }
  0x37   : > { %p1070_p7 = pnand %p1068_p5, %p1334_p13  ;;  %p1077_p1 = por %p1076_p0, %p1075_p12 }
  0x39   : > { %p1071_p9 = pneg %p1070_p7 }
  0x3b   : > { %p1078_p2 = pnand %p1077_p1, %p1071_p9 }
  0x3d   : > { %1081 = shalt.err (!%p1078_p2)
}
  0x3e   : > { %938 = dma.hbm_to_vmem [thread:$0]  (!%p1318_p11), %s1578_s3, 1024, %s1322_s14, [#allocation6], %s1219_s13, %s1219_s13, %s1220_s15  }
  0x3f   : > { %s1082_s20 = scalar_lea.hbm %s1580_s5, 1024 }
  0x40   : > { %p1083_p6 = scmp.ne.s32.totalorder %s1580_s5, %s1082_s20  ;;  %p1089_p5 = scmp.lt.u32.totalorder %s1082_s20, %s1580_s5 }
  0x42   : > { %p1085_p10 = pnand %p1083_p6, %p1334_p13 }
  0x44   : > { %p1086_p3 = pneg %p1085_p10 }
  0x46   : > { %p1091_p7 = pnand %p1089_p5, %p1086_p3 }
  0x48   : > { %1094 = shalt.err (!%p1091_p7)
}
  0x49   : > { %s1095_s11 = scalar_lea.vmem %s253_s16, 1024  ;;  %p1103_p1 = scmp.lt.s32.totalorder %s253_s16, %s253_s16 }
  0x4a   : > { %p1096_p9 = scmp.ne.s32.totalorder %s253_s16, %s1095_s11  ;;  %p1104_p2 = scmp.lt.s32.totalorder %s1095_s11, %s1095_s11 }
  0x4c   : > { %p1098_p12 = pnand %p1096_p9, %p1334_p13  ;;  %p1105_p4 = por %p1104_p2, %p1103_p1 }
  0x4e   : > { %p1099_p0 = pneg %p1098_p12 }
  0x50   : > { %p1106_p8 = pnand %p1105_p4, %p1099_p0 }
  0x52   : > { %1109 = shalt.err (!%p1106_p8)
}
  0x53   : > { %941 = dma.hbm_to_vmem [thread:$0]  (!%p1318_p11), %s1580_s5, 1024, %s253_s16, [#allocation9], %s1219_s13, %s1219_s13, %s1220_s15  }
  0x54   : > { %s1407_s22 = sadd.s32 1, %s1214_s27   ;;  %s32_s17 = sadd.s32 1, %s1210_s26 }
  0x55   : > { %s29_s12 = ssub.s32 %s1214_s27, %s1407_s22  ;;  %p39_p8 = scmp.ne.s32.totalorder %s1210_s26, %s1206_s25 }
  0x56   : > { %p30_p4 = scmp.eq.s32.totalorder %s29_s12, 0  ;;  %p40_p13 = scmp.eq.s32.totalorder %s1214_s27, 0 }
  0x57   : > { %p953_p6 = scmp.lt.s32.totalorder %s1214_s27, 2  ;;  %p1593_p3 = scmp.eq.s32.totalorder %s1288_s28, 1 }
  0x58   : > { %s1417_s18 = scalar_select %p30_p4, %s1210_s26, %s32_s17  }
  0x59   : > { %p41_p10 = por %p40_p13, %p39_p8  ;;  %p1421_p5 = por %p1593_p3, %p39_p8 }
  0x5a   : > { %s269_s20 = sand.u32 1, %s1210_s26   ;;  %s838_s21 = sshll.u32 %s1214_s27, 7 }
  0x5b   : > { %s799_s16 = sshll.u32 %s269_s20, 3  ;;  %s1430_s10 = scalar_lea.hbm %s1575_s0, %s838_s21 }
  0x5c   : > { %s273_s11 = scalar_lea.vmem [#allocation2], %s799_s16  ;;  %p1432_p11 = pnand %p953_p6, %p41_p10 }
  0x5d   : > { %s280_s14 = sshll.u32 %s273_s11, 4  ;;  %s1438_s12 = scalar_lea.sflag [#allocation3], %s269_s20  ;;  %s1436_s14 = int_to_ptr.vmem [resolvable:$true] %s280_s14 }
  0x5e   : > { %s1110_s17 = scalar_lea.hbm %s1430_s10, 128  ;;  %p1112_p9 = pneg %p1432_p11 }
  0x5f   : > { %p1111_p7 = scmp.ne.s32.totalorder %s1430_s10, %s1110_s17  ;;  %s1115_s23 = scalar_lea.hbm %s1575_s0, 256 }
  0x60   : > { %p1116_p1 = scmp.lt.u32.totalorder %s1430_s10, %s1575_s0  ;;  %p1117_p2 = scmp.lt.u32.totalorder %s1115_s23, %s1110_s17 }
  0x61   : > { %p1113_p12 = pnand %p1112_p9, %p1111_p7  ;;  %p1119_p8 = scmp.lt.u32.totalorder %s1110_s17, %s1430_s10 }
  0x62   : > { %p1118_p4 = por %p1117_p2, %p1116_p1 }
  0x63   : > { %p1114_p0 = pneg %p1113_p12 }
  0x64   : > { %p1120_p13 = por %p1119_p8, %p1118_p4 }
  0x66   : > { %p1121_p6 = pnand %p1120_p13, %p1114_p0 }
  0x68   : > { %1124 = shalt.err (!%p1121_p6)
}
  0x69   : > { %s1125_s20 = scalar_lea.vmem %s1436_s14, 128  ;;  %s1221_s21 = smov [#allocation2]  }
  0x6a   : > { %p1126_p10 = scmp.ne.s32.totalorder %s1436_s14, %s1125_s20  ;;  %s1130_s16 = sshll.u32 %s1221_s21, 4  ;;  %s1131_s16 = int_to_ptr.vmem [resolvable:$false] %s1130_s16 }
  0x6b   : > { %s1132_s29 = scalar_lea.vmem %s1131_s16, 256  ;;  %p1133_p12 = scmp.lt.s32.totalorder %s1436_s14, %s1131_s16 }
  0x6c   : > { %p1128_p3 = pnand %p1126_p10, %p1112_p9  ;;  %p1134_p1 = scmp.lt.s32.totalorder %s1132_s29, %s1125_s20 }
  0x6e   : > { %p1129_p7 = pneg %p1128_p3  ;;  %p1135_p2 = por %p1134_p1, %p1133_p12 }
  0x70   : > { %p1136_p4 = pnand %p1135_p2, %p1129_p7 }
  0x72   : > { %1139 = shalt.err (!%p1136_p4)
}
  0x73   : > { %945 = dma.hbm_to_vmem [thread:$0]  (!%p1432_p11), %s1430_s10, 128, %s1436_s14, %s1438_s12, %s1219_s13, %s1219_s13, %s1220_s15  }
  0x74   : > { %p1596_p9 = scmp.ne.s32.totalorder %s1590_s9, 0 }
  0x75   : > { %s1472_s17 = sand.u32 (!%p1596_p9), 1, %s1206_s25   ;;  %p1597_p0 = scmp.ne.s32.totalorder (!%p1596_p9), %s1587_s30, 0 }
  0x76   : > { %292 = sbr.rel (%p1596_p9) target bundleno = 1130 (0x46a), region = 48  ;;  %s803_s23 = sshll.u32 (!%p1596_p9), %s1472_s17, 3 }
  0x77   : > { %s295_s11 = scalar_lea.sflag (!%p1596_p9), [#allocation3], %s1472_s17  ;;  %s298_s8 = scalar_lea.vmem (!%p1596_p9), [#allocation2], %s803_s23 }
  0x7d   : > { %1185 = dma.done.wait (%p1597_p0), %s295_s11, 128  }
  0x7e   : > { %1187 = vsyncadd (%p1597_p0), %s295_s11, 4294967168  ;;  %p1598_p11 = scmp.eq.s32.totalorder %s1288_s28, 0 }
  0x80   : > { %1189 = dma.done.wait (%p1598_p11), [#allocation6], 1280   ;;  %p1599_p8 = pmov %p1598_p11 }
  0x82   : > { %1191 = vsyncadd (%p1599_p8), [#allocation6], 4294966016  ;;  %p1600_p13 = pmov %p1599_p8 }
  0x83   : > { %p1601_p6 = pmov %p1599_p8 }
  0x84   : > { %1193 = dma.done.wait (%p1600_p13), [#allocation9], 1024  }
  0x85   : > { %1195 = vsyncadd (%p1601_p6), [#allocation9], 4294966272  ;;  %v1222_v0 = vmov 0.0   ;;  %vm1223_vm0 = vmmov 0   ;;  %v999_v1 = vld [vmem:[#allocation5] sm:$0xff]   ;;  %v1000_v2 = vld [vmem:[#allocation5 + $0x8] sm:$0xff]  }
  0x86   : > { %868 = vmatprep.subr.bf16.mxu0 %v1222_v0  ;;  %872 = vmatprep.mubr.msk.bf16.mxu0 %vm1223_vm0, %v1222_v0  ;;  %v1002_v3 = vld [vmem:[#allocation7] sm:$0xff]   ;;  %v1003_v5 = vld [vmem:[#allocation7 + $0x8] sm:$0xff]   ;;  %vm374_vm1 = vcmask 261120   ;;  %v1004_v6 = vld [vmem:[#allocation7 + $0x10] sm:$0xff]   ;;  %s841_s12 = sshll.u32 %s1288_s28, 7  ;;  %s340_s20 = scalar_lea.vmem [#allocation10], %s803_s23 }
  0x87   : > { %876 = vmatprep.subr.bf16.mxu1 %v1222_v0  ;;  %892 = vmatprep.mubr.msk.bf16.mxu1 %vm1223_vm0, %v1222_v0  ;;  %v1001_v4 = vld [vmem:[%s298_s8] sm:$0xff]   ;;  %v1005_v7 = vld [vmem:[#allocation7 + $0x18] sm:$0xff]   ;;  %v1008_v10 = vld [vmem:[#allocation7 + $0x30] sm:$0xff]   ;;  %s691_s21 = sshll.u32 %s340_s20, 4  ;;  %s1529_s11 = scalar_lea.hbm %s1582_s7, %s841_s12  ;;  %s1531_s21 = int_to_ptr.vmem [resolvable:$true] %s691_s21 }
  0x88   : > { %869 = vmatpush3.bf16.msra.mxu0 %v999_v1  ;;  %877 = vmatpush3.bf16.msra.mxu1 %v1002_v3  ;;  %v1006_v8 = vld [vmem:[#allocation7 + $0x20] sm:$0xff]   ;;  %v1007_v9 = vld [vmem:[#allocation7 + $0x28] sm:$0xff]   ;;  %v1009_v11 = vld [vmem:[#allocation7 + $0x38] sm:$0xff]   ;;  %s678_s8 = scalar_lea.sflag [#allocation4], %s1472_s17  ;;  %s1140_s28 = scalar_lea.vmem %s1531_s21, 128 }
  0x89   : > { %870 = vmatprep.subr.bf16.mxu0 %v1222_v0  ;;  %878 = vmatprep.subr.bf16.mxu1 %v1222_v0  ;;  %v1010_v12 = vld [vmem:[#allocation8] sm:$0xff]   ;;  %v1011_v13 = vld [vmem:[#allocation8 + $0x8] sm:$0xff]   ;;  %v1012_v14 = vld [vmem:[#allocation8 + $0x10] sm:$0xff]   ;;  %p1141_p10 = scmp.ne.s32.totalorder %s1531_s21, %s1140_s28  ;;  %s1224_s23 = smov [#allocation10]  }
  0x8a   : > { %v1013_v15 = vld [vmem:[#allocation8 + $0x18] sm:$0xff]   ;;  %v1014_v16 = vld [vmem:[#allocation8 + $0x20] sm:$0xff]   ;;  %v1015_v17 = vld [vmem:[#allocation8 + $0x28] sm:$0xff]   ;;  %s1144_s30 = sshll.u32 %s1224_s23, 4  ;;  %s1145_s30 = int_to_ptr.vmem [resolvable:$false] %s1144_s30 }
  0x8b   : > { %v808_v18 = vld [vmem:[%s1577_s2] ss:$0 sm:$0xff]  ;;  %v1016_v28 = vld [vmem:[#allocation8 + $0x30] sm:$0xff]   ;;  %v1017_v29 = vld [vmem:[#allocation8 + $0x38] sm:$0xff]   ;;  %p1142_p3 = pnand %p1141_p10, %p1421_p5  ;;  %s1146_s9 = scalar_lea.vmem %s1145_s30, 256 }
  0x8c   : > { %871 = vmatpush3.bf16.msra.mxu0 %v1000_v2  ;;  %879 = vmatpush3.bf16.msra.mxu1 %v1003_v5  ;;  %v813_v30 = vld [vmem:[%s1579_s4] ss:$0 sm:$0xff]  ;;  %p1147_p12 = scmp.lt.s32.totalorder %s1531_s21, %s1145_s30  ;;  %p1148_p1 = scmp.lt.s32.totalorder %s1146_s9, %s1140_s28 }
  0x8d   : > { %896 = vmatprep.subr.bf16.mxu0 %v1222_v0  ;;  %880 = vmatprep.subr.bf16.mxu1 %v1222_v0  ;;  %v822_v40 = vld [vmem:[%s1581_s6] ss:$0 sm:$0xff]  ;;  %p1143_p7 = pneg %p1142_p3 }
  0x8e   : > { %p1149_p2 = por %p1148_p1, %p1147_p12 }
  0x8f   : > { %873 = vmatmul.mubr.msk.bf16.vlgmr.msra.gmra.mrb[0].mxu0 %vm374_vm1, %v1001_v4 }
  0x90   : > { %912 = vmatprep.mubr.msk.bf16.mxu0 %vm1223_vm0, %v1222_v0  ;;  %881 = vmatpush3.bf16.msra.mxu1 %v1004_v6  ;;  %p1150_p4 = pnand %p1149_p2, %p1143_p7 }
  0x91   : > { %882 = vmatprep.subr.bf16.mxu1 %v1222_v0  ;;  %897 = vmatpush3.bf16.msra.mxu0 %v1010_v12 }
  0x92   : > { %898 = vmatprep.subr.bf16.mxu0 %v1222_v0 }
  0x94   : > { %883 = vmatpush3.bf16.msra.mxu1 %v1005_v7 }
  0x95   : > { %884 = vmatprep.subr.bf16.mxu1 %v1222_v0  ;;  %899 = vmatpush3.bf16.msra.mxu0 %v1011_v13 }
  0x96   : > { %900 = vmatprep.subr.bf16.mxu0 %v1222_v0 }
  0x98   : > { %885 = vmatpush3.bf16.msra.mxu1 %v1006_v8 }
  0x99   : > { %886 = vmatprep.subr.bf16.mxu1 %v1222_v0  ;;  %901 = vmatpush3.bf16.msra.mxu0 %v1012_v14 }
  0x9a   : > { %902 = vmatprep.subr.bf16.mxu0 %v1222_v0 }
  0x9c   : > { %887 = vmatpush3.bf16.msra.mxu1 %v1007_v9 }
  0x9d   : > { %888 = vmatprep.subr.bf16.mxu1 %v1222_v0  ;;  %903 = vmatpush3.bf16.msra.mxu0 %v1013_v15 }
  0x9e   : > { %904 = vmatprep.subr.bf16.mxu0 %v1222_v0 }
  0xa0   : > { %889 = vmatpush3.bf16.msra.mxu1 %v1008_v10 }
  0xa1   : > { %890 = vmatprep.subr.bf16.mxu1 %v1222_v0  ;;  %905 = vmatpush3.bf16.msra.mxu0 %v1014_v16 }
  0xa2   : > { %906 = vmatprep.subr.bf16.mxu0 %v1222_v0 }
  0xa4   : > { %891 = vmatpush3.bf16.msra.mxu1 %v1009_v11 }
  0xa5   : > { %907 = vmatpush3.bf16.msra.mxu0 %v1015_v17 }
  0xa6   : > { %908 = vmatprep.subr.bf16.mxu0 %v1222_v0 }
  0xa9   : > { %909 = vmatpush3.bf16.msra.mxu0 %v1016_v28 }
  0xaa   : > { %910 = vmatprep.subr.bf16.mxu0 %v1222_v0 }
  0xad   : > { %911 = vmatpush3.bf16.msra.mxu0 %v1017_v29 }
 0x162   : > { %v412_v19 = vpop.f32.mrb[0].mxu0 }
 0x163   : > { %v413_v20 = vadd.f32 %v808_v18, %v412_v19  ;;  %v874_v21 = vpop.f32.mrb[1].mxu0 }
 0x164   : > { %v415_v22 = vpop.f32.mrb[2].mxu0 }
 0x165   : > { %v416_v23 = vadd.f32 %v808_v18, %v415_v22  ;;  %v875_v24 = vpop.f32.mrb[3].mxu0  ;;  %v419_v25 = vmax.f32 %v413_v20, 0.0 }
 0x167   : > { %v420_v26 = vmax.f32 %v416_v23, 0.0 }
 0x169   : > { %v421_v27 = vpack.c.bf16 %v420_v26, %v419_v25 }
 0x16b   : > { %893 = vmatmul.mubr.bf16.vlgmr.msra.gmra.mrb[0].mxu1 %v421_v27 }
 0x23e   : > { %v527_v31 = vpop.f32.mrb[0].mxu1 }
 0x23f   : > { %v528_v32 = vadd.f32 %v813_v30, %v527_v31  ;;  %v894_v33 = vpop.f32.mrb[1].mxu1 }
 0x240   : > { %v530_v34 = vpop.f32.mrb[2].mxu1 }
 0x241   : > { %v531_v35 = vadd.f32 %v813_v30, %v530_v34  ;;  %v895_v36 = vpop.f32.mrb[3].mxu1  ;;  %v534_v37 = vmax.f32 %v528_v32, 0.0 }
 0x243   : > { %v535_v38 = vmax.f32 %v531_v35, 0.0 }
 0x245   : > { %v536_v39 = vpack.c.bf16 %v535_v38, %v534_v37 }
 0x247   : > { %913 = vmatmul.mubr.bf16.vlgmr.msra.gmra.mrb[4].mxu0 %v536_v39 }
 0x31a   : > { %v642_v41 = vpop.f32.mrb[4].mxu0 }
 0x31b   : > { %v643_v42 = vadd.f32 %v822_v40, %v642_v41  ;;  %v914_v43 = vpop.f32.mrb[5].mxu0 }
 0x31c   : > { %v645_v44 = vpop.f32.mrb[6].mxu0 }
 0x31d   : > { %649 = vmax.xlane.f32.xlu0 %v643_v42  ;;  %v915_v45 = vpop.f32.mrb[7].mxu0  ;;  %v646_v46 = vadd.f32 %v822_v40, %v645_v44 }
 0x321   : > { %651 = vmax.xlane.f32.xlu0 %v646_v46 }
 0x3aa   : > { %v650_v47 = vpop.xlane.xlu0 %649 }
 0x3ab   : > { %v653_v48 = vsub.f32 %v643_v42, %v650_v47 }
 0x3ad   : > { %v655_v49 = vmul.f32 1.442695, %v653_v48 }
 0x3ae   : > { %v652_v50 = vpop.xlane.xlu0 %651 }
 0x3af   : > { %1018 = vpow2.f32 %v655_v49  ;;  %v654_v51 = vsub.f32 %v646_v46, %v652_v50 }
 0x3b1   : > { %v657_v52 = vmul.f32 1.442695, %v654_v51 }
 0x3b3   : > { %1020 = vpow2.f32 %v657_v52 }
 0x3b9   : > { %v1019_v53 = vpop.eup %1018 }
 0x3ba   : > { %659 = vadd.xlane.f32.xlu1 %v1019_v53 }
 0x3bd   : > { %v1021_v54 = vpop.eup %1020 }
 0x3be   : > { %661 = vadd.xlane.f32.xlu1 %v1021_v54 }
 0x447   : > { %v660_v55 = vpop.xlane.xlu1 %659 }
 0x448   : > { %1022 = vrcp.f32 %v660_v55 }
 0x44b   : > { %v662_v56 = vpop.xlane.xlu1 %661 }
 0x44c   : > { %1024 = vrcp.f32 %v662_v56 }
 0x452   : > { %v1023_v57 = vpop.eup %1022 }
 0x453   : > { %v665_v59 = vmul.f32 %v1023_v57, %v1019_v53 }
 0x456   : > { %v1025_v58 = vpop.eup %1024 }
 0x457   : > { %v666_v60 = vmul.f32 %v1025_v58, %v1021_v54 }
 0x459   : > { %v845_v61 = vpack.c.bf16 %v666_v60, %v665_v59 }
 0x45b   : > { %846 = vst [vmem:[%s340_s20] sm:$0xff] %v845_v61  }
 0x45c   : > { %1153 = shalt.err (!%p1150_p4)
}
 0x45d   : > { %s1154_s13 = scalar_lea.hbm %s1529_s11, 128  ;;  %s1158_s14 = scalar_lea.hbm %s1582_s7, 256 }
 0x45e   : > { %p1155_p9 = scmp.ne.s32.totalorder %s1529_s11, %s1154_s13  ;;  %p1159_p8 = scmp.lt.u32.totalorder %s1529_s11, %s1582_s7 }
 0x45f   : > { %p1160_p13 = scmp.lt.u32.totalorder %s1158_s14, %s1154_s13  ;;  %p1162_p10 = scmp.lt.u32.totalorder %s1154_s13, %s1529_s11 }
 0x460   : > { %p1156_p0 = pnand %p1155_p9, %p1421_p5 }
 0x461   : > { %p1161_p6 = por %p1160_p13, %p1159_p8 }
 0x462   : > { %p1157_p11 = pneg %p1156_p0 }
 0x463   : > { %p1163_p3 = por %p1162_p10, %p1161_p6 }
 0x465   : > { %p1164_p7 = pnand %p1163_p3, %p1157_p11 }
 0x467   : > { %1167 = shalt.err (!%p1164_p7)
}
 0x468   : > { %s1225_s16 = smov 64   ;;  %s1226_s29 = smov 4  }
 0x469   : > { %930 = dma.vmem_to_hbm [thread:$0]  (%p1421_p5), %s1531_s21, 128, %s1529_s11, %s678_s8, %s1225_s16, %s1225_s16, %s1226_s29  }
 0x46a PF: > { %s1602_s28 = sld [smem:[#allocation15_spill]]  ;;  %s706_s23 = sand.u32 1, %s1202_s24  }
 0x46b   : > { %p1604_p1 = scmp.ge.s32.totalorder %s1214_s27, 2  ;;  %s707_s30 = scalar_lea.sflag [#allocation4], %s706_s23 }
 0x470   : > { %p1603_p12 = scmp.ne.s32.totalorder %s1602_s28, 0 }
 0x472   : > { %p947_p2 = pnand %p1604_p1, %p1603_p12 }
 0x474   : > { %1197 = dma.done.wait (!%p947_p2), %s707_s30, 128  }
 0x475   : > { %1199 = vsyncadd (!%p947_p2), %s707_s30, 4294967168  ;;  %p22_p4 = scmp.ge.s32.totalorder %s1407_s22, 4   ;;  %s1605_s24 = smov %s1206_s25 }
 0x476   : > { %s1606_s25 = smov %s1210_s26  ;;  %s1607_s26 = smov %s1417_s18 }
 0x477   : > { %s1608_s27 = smov %s1407_s22  ;;  %24 = sbr.rel (!%p22_p4) target bundleno = 7 (0x7), region = 105 }
 0x47e   :  { %712 = vsyncpa [#allocation3], 1 }
 0x47f   :  { %714 = vsyncpa [#allocation3 + $0x1], 1 }
 0x480   :  { %715 = vsyncpa [#allocation6], 1 }
 0x481   :  { %716 = vsyncpa [#allocation9], 1 }
 0x482   :  { %717 = vsyncpa [#allocation4], 1 }
 0x483   :  { %719 = vsyncpa [#allocation4 + $0x1], 1 }

</bundles_post_ra>
